<compile_context>
chip_gen: v6e
topology: v6e:2x2x1
jax: 0.10.0
libtpu: 0.0.40
codegen_flags: <defaults>
</compile_context>

<pallas_src>
import jax
import jax.numpy as jnp
from jax.experimental import pallas as pl
from jax.experimental.pallas import tpu as pltpu


# ---------------------------------------------------------------------------
# Kernels
# ---------------------------------------------------------------------------

def _proj_kernel(x_ref, p_ref, c_ref, o_ref):
    # out = x @ P - c      (P = I - u u^T, c = mean @ P; both precomputed)
    xp = jnp.dot(x_ref[...], p_ref[...], preferred_element_type=jnp.float32)
    o_ref[...] = (xp - c_ref[...]).astype(o_ref.dtype)


def _lowrank_kernel(x_ref, u_ref, ut_ref, c_ref, o_ref):
    # out = x - ((x @ u) @ u^T + c)
    # x stays in its native dtype (full-rate MXU input, no f32 tile copy);
    # the small correction accumulates in f32 and is cast once at the end.
    x = x_ref[...]
    t = jnp.dot(x, u_ref[...], preferred_element_type=jnp.float32)       # (tm, r_pad) f32
    proj = jnp.dot(t, ut_ref[...], preferred_element_type=jnp.float32)   # (tm, d_pad) f32
    corr = (proj + c_ref[...]).astype(x.dtype)
    o_ref[...] = (x - corr).astype(o_ref.dtype)


# ---------------------------------------------------------------------------
# Wrapper
# ---------------------------------------------------------------------------

def _round_up(a, m):
    return ((a + m - 1) // m) * m


def _vmem_limit_bytes():
    """Per-generation VMEM budget (v7x has 64 MiB physical vs 128 MiB)."""
    try:
        cap = int(pltpu.get_tpu_info().vmem_capacity_bytes)
    except Exception:
        cap = 64 * 1024 * 1024  # conservative fallback, safe on every gen
    return min(int(cap * 3 // 4), 100 * 1024 * 1024)


def _pick_tm(n_rows, d_pad, in_itemsize, out_itemsize, vmem_limit, fixed_bytes):
    # Double-buffered x tile + double-buffered out tile dominate VMEM.
    per_row = 2 * d_pad * in_itemsize + 2 * d_pad * out_itemsize
    budget = max(vmem_limit - fixed_bytes - (4 << 20), per_row * 8)
    tm = int(budget // per_row)
    # Big tiles (mem-bound kernel, grid is a serial loop per TensorCore);
    # no minimum-step-count floor, just don't exceed the actual row count.
    tm = min(tm, 1024, _round_up(n_rows, 8))
    if tm >= 256:
        tm = (tm // 256) * 256   # full 2x256 MXU passes on v6e/v7x
    else:
        tm = (tm // 8) * 8       # sublane-aligned
    return max(tm, 8)


def concept_eraser_forward(x, mean_x, u, *, tm=None, use_projector=None):
    """Apply ConceptEraser.forward. x: [..., d]; mean_x: [d]; u: [d, r].

    For repeated calls with the same statistics, jit the surrounding function
    so the (cheap, rank-r) parameter prep below is CSE'd across calls.
    """
    d = x.shape[-1]
    r = u.shape[-1]
    assert mean_x.shape == (d,)
    assert u.shape[0] == d
    lead_shape = x.shape[:-1]
    out_dtype = x.dtype

    x2d = x.reshape(-1, d)
    n_rows = x2d.shape[0]

    d_pad = _round_up(d, 128)   # lane-dense last dim
    r_pad = _round_up(r, 128)   # lane-dense low-rank intermediate
    needs_d_pad = d_pad != d

    in_isz = jnp.dtype(x.dtype).itemsize
    out_isz = jnp.dtype(out_dtype).itemsize
    vmem_limit = _vmem_limit_bytes()

    # -- parameter setup in plain JAX (glue; low-rank default never builds P).
    # TODO(synk): torch.linalg.qr / svd_lowrank (basis computation) and the
    # running-stat update() have no Pallas equivalent; plain JAX setup.
    u32 = u.astype(jnp.float32)
    mean32 = mean_x.astype(jnp.float32)
    c = mean32 - (mean32 @ u32) @ u32.T            # mean @ (I - u u^T), shape (d,)
    if needs_d_pad:
        c_pad = jnp.zeros((1, d_pad), jnp.float32).at[0, :d].set(c)
    else:
        c_pad = c.reshape(1, d_pad)

    # FLOP-based strategy: the correction is rank r (padded to 128 lanes), so
    # the dense (d,d) projector only wins when d_pad is no wider than the two
    # low-rank MXU passes combined (~2*r_pad). Otherwise the low-rank path is
    # HBM-roofline bound (read x + write out) — the floor on every generation.
    if use_projector is None:
        use_projector = d_pad <= 2 * r_pad

    # Grid-invariant operand VMEM (single-buffered via pl.Buffered(1)).
    if use_projector:
        fixed = d_pad * d_pad * in_isz + d_pad * 4
    else:
        fixed = d_pad * r_pad * in_isz + r_pad * d_pad * 4 + d_pad * 4

    if tm is None:
        tm = _pick_tm(n_rows, d_pad, in_isz, out_isz, vmem_limit, fixed)
    else:
        tm = max(8, (int(tm) // 8) * 8)

    # Only pad the hidden dim when it isn't already lane-dense; rows stay
    # ragged (Pallas masks the partial last row-block on writeback, and
    # garbage boundary-row reads only pollute rows that are never written).
    if needs_d_pad:
        xp = jnp.zeros((n_rows, d_pad), x.dtype).at[:, :d].set(x2d)
    else:
        xp = x2d

    grid = (pl.cdiv(n_rows, tm),)
    out_shape = jax.ShapeDtypeStruct((n_rows, d_pad), out_dtype)
    compiler_params = pltpu.CompilerParams(
        dimension_semantics=("parallel",),
        vmem_limit_bytes=int(vmem_limit),
    )
    x_spec = pl.BlockSpec((tm, d_pad), lambda i: (i, 0))
    o_spec = pl.BlockSpec((tm, d_pad), lambda i: (i, 0))

    if use_projector:
        P = jnp.eye(d, dtype=jnp.float32) - u32 @ u32.T
        if needs_d_pad:
            P_op = jnp.zeros((d_pad, d_pad), jnp.float32).at[:d, :d].set(P)
        else:
            P_op = P
        P_op = P_op.astype(x.dtype)                 # MXU-native dtype for x @ P
        kernel = _proj_kernel
        operands = (xp, P_op, c_pad)
        inv_shapes = [(d_pad, d_pad), (1, d_pad)]
    else:
        if needs_d_pad or r_pad != r:
            u_op32 = jnp.zeros((d_pad, r_pad), jnp.float32).at[:d, :r].set(u32)
        else:
            u_op32 = u32
        ut_op = jnp.transpose(u_op32)               # f32: second dot t(f32) @ u^T(f32)
        u_op = u_op32.astype(x.dtype)               # native-rate first matmul x @ u
        kernel = _lowrank_kernel
        operands = (xp, u_op, ut_op, c_pad)
        inv_shapes = [(d_pad, r_pad), (r_pad, d_pad), (1, d_pad)]

    def _call(single_buffer_invariants):
        def inv_spec(shape):
            if single_buffer_invariants:
                # Grid-invariant: one VMEM buffer is enough (no re-fetch).
                return pl.BlockSpec(shape, lambda i: (0, 0),
                                    pipeline_mode=pl.Buffered(1))
            return pl.BlockSpec(shape, lambda i: (0, 0))
        return pl.pallas_call(
            kernel,
            out_shape=out_shape,
            grid_spec=pltpu.PrefetchScalarGridSpec(
                num_scalar_prefetch=0,
                grid=grid,
                in_specs=[x_spec] + [inv_spec(s) for s in inv_shapes],
                out_specs=o_spec,
            ),
            compiler_params=compiler_params,
        )(*operands)

    try:
        out = _call(True)     # single-buffered grid-invariant weights
    except Exception:
        out = _call(False)    # fallback: Pallas without pipeline_mode/Buffered

    if needs_d_pad:
        out = out[:, :d]
    return out.reshape(*lead_shape, d)


# ---------------------------------------------------------------------------
# Reference / demo
# ---------------------------------------------------------------------------

def _reference_forward(x, mean_x, u):
    x_c = x - mean_x
    proj = jnp.einsum("...d,dr,er->...e", x_c, u, u)
    return x_c - proj


if __name__ == "__main__":
    key = jax.random.PRNGKey(0)
    k_x, k_mx, k_cov, k_x2, k_mx2, k_cov2, k_x3 = jax.random.split(key, 7)

    # ---- Case A: module config x_dim=32, y_dim=4; x = [2, 8, 32] ----------
    x_dim, y_dim = 32, 4
    x = jax.random.normal(k_x, (2, 8, x_dim), dtype=jnp.float32)
    mean_x = 0.1 * jax.random.normal(k_mx, (x_dim,), dtype=jnp.float32)
    xcov_M2 = jax.random.normal(k_cov, (x_dim, y_dim), dtype=jnp.float32)
    n = jnp.float32(16.0)
    # u = QR(xcov_M2 / n).Q  (basis setup; no Pallas equivalent, plain JAX)
    u, _ = jnp.linalg.qr(xcov_M2 / n)   # [x_dim, rank]

    ref = _reference_forward(x, mean_x, u)
    out = jax.block_until_ready(concept_eraser_forward(x, mean_x, u))
    assert out.shape == x.shape
    assert jnp.allclose(out, ref, atol=1e-4, rtol=1e-4), "default path mismatch"
    out_lr = jax.block_until_ready(
        concept_eraser_forward(x, mean_x, u, use_projector=False))
    assert jnp.allclose(out_lr, ref, atol=1e-4, rtol=1e-4), "low-rank path mismatch"

    # ---- Case B: ragged row count + lane padding (d=32, rows=15) -----------
    x2 = jax.random.normal(k_x2, (3, 5, x_dim), dtype=jnp.float32)
    ref2 = _reference_forward(x2, mean_x, u)
    out_p = jax.block_until_ready(
        concept_eraser_forward(x2, mean_x, u, use_projector=True))
    out_l = jax.block_until_ready(
        concept_eraser_forward(x2, mean_x, u, use_projector=False))
    assert out_p.shape == x2.shape and out_l.shape == x2.shape
    assert jnp.allclose(out_p, ref2, atol=1e-4, rtol=1e-4), "padded projector mismatch"
    assert jnp.allclose(out_l, ref2, atol=1e-4, rtol=1e-4), "padded low-rank mismatch"

    # ---- Case C: lane-dense hidden (d=128): no pad copy, ragged rows -------
    x_dim3 = 128
    x3 = jax.random.normal(k_x3, (3, 5, x_dim3), dtype=jnp.float32)
    mean_x3 = 0.1 * jax.random.normal(k_mx2, (x_dim3,), dtype=jnp.float32)
    xcov3 = jax.random.normal(k_cov2, (x_dim3, y_dim), dtype=jnp.float32)
    u3, _ = jnp.linalg.qr(xcov3 / n)
    ref3 = _reference_forward(x3, mean_x3, u3)
    out3_l = jax.block_until_ready(
        concept_eraser_forward(x3, mean_x3, u3, use_projector=False))
    out3_p = jax.block_until_ready(
        concept_eraser_forward(x3, mean_x3, u3, use_projector=True))
    assert jnp.allclose(out3_l, ref3, atol=1e-4, rtol=1e-4), "dense-d low-rank mismatch"
    assert jnp.allclose(out3_p, ref3, atol=1e-4, rtol=1e-4), "dense-d projector mismatch"

    print("KERNEL_OK")
</pallas_src>

<mosaic_0001>
module attributes {stable_mosaic.version = 11 : i64} {
  func.func @_proj_kernel(%arg0: i32, %arg1: memref<16x128xf32, #tpu.memory_space<vmem>>, %arg2: memref<128x128xf32, #tpu.memory_space<vmem>>, %arg3: memref<1x128xf32, #tpu.memory_space<vmem>>, %arg4: memref<16x128xf32, #tpu.memory_space<vmem>>) attributes {dimension_semantics = [#tpu.dimension_semantics<parallel>], iteration_bounds = array<i64: 1>, scalar_prefetch = 0 : i64, scratch_operands = 0 : i64, tpu.core_type = #tpu.core_type<tc>, window_params = [{transform_indices = @transform_0, window_bounds = array<i64: 16, 128>}, {pipeline_mode = #tpu.pipeline_mode<synchronous>, transform_indices = @transform_1, window_bounds = array<i64: 128, 128>}, {pipeline_mode = #tpu.pipeline_mode<synchronous>, transform_indices = @transform_2, window_bounds = array<i64: 1, 128>}, {transform_indices = @transform_3, window_bounds = array<i64: 16, 128>}]} {
    %c0 = arith.constant 0 : index
    %c0_0 = arith.constant 0 : index
    %0 = vector.load %arg1[%c0, %c0_0] : memref<16x128xf32, #tpu.memory_space<vmem>>, vector<16x128xf32>
    %c0_1 = arith.constant 0 : index
    %c0_2 = arith.constant 0 : index
    %1 = vector.load %arg2[%c0_1, %c0_2] : memref<128x128xf32, #tpu.memory_space<vmem>>, vector<128x128xf32>
    %cst = arith.constant dense<0.000000e+00> : vector<16x128xf32>
    %2 = tpu.matmul %0, %1, %cst {dimension_numbers = #tpu.dot_dimension_numbers<[1], [0], [0], [1], [0, 0, 1, 1], [], []>} : vector<16x128xf32>, vector<128x128xf32>, vector<16x128xf32> -> vector<16x128xf32>
    %c0_3 = arith.constant 0 : index
    %c0_4 = arith.constant 0 : index
    %3 = vector.load %arg3[%c0_3, %c0_4] : memref<1x128xf32, #tpu.memory_space<vmem>>, vector<1x128xf32>
    %4 = vector.broadcast %3 : vector<1x128xf32> to vector<16x128xf32>
    %5 = arith.subf %2, %4 : vector<16x128xf32>
    %c0_5 = arith.constant 0 : index
    %c0_6 = arith.constant 0 : index
    %6 = vector.load %arg4[%c0_5, %c0_6] : memref<16x128xf32, #tpu.memory_space<vmem>>, vector<16x128xf32>
    tpu.vector_store %arg4[%c0_5, %c0_6], %5 {strides = array<i32>} : memref<16x128xf32, #tpu.memory_space<vmem>>, vector<16x128xf32>,
    return
  }
  func.func @transform_0(%arg0: i32) -> (i32, i32) {
    %c0_i32 = arith.constant 0 : i32
    %c0_i32_0 = arith.constant 0 : i32
    return %arg0, %c0_i32 : i32, i32
  }
  func.func @transform_1(%arg0: i32) -> (i32, i32) {
    %c0_i32 = arith.constant 0 : i32
    %c0_i32_0 = arith.constant 0 : i32
    %c0_i32_1 = arith.constant 0 : i32
    return %c0_i32, %c0_i32_0 : i32, i32
  }
  func.func @transform_2(%arg0: i32) -> (i32, i32) {
    %c0_i32 = arith.constant 0 : i32
    %c0_i32_0 = arith.constant 0 : i32
    %c0_i32_1 = arith.constant 0 : i32
    return %c0_i32, %c0_i32_0 : i32, i32
  }
  func.func @transform_3(%arg0: i32) -> (i32, i32) {
    %c0_i32 = arith.constant 0 : i32
    %c0_i32_0 = arith.constant 0 : i32
    return %arg0, %c0_i32 : i32, i32
  }
}

module attributes {stable_mosaic.version = 11 : i64} {
  func.func @_proj_kernel(%arg0: i32, %arg1: memref<16x128xf32, #tpu.memory_space<vmem>>, %arg2: memref<128x128xf32, #tpu.memory_space<vmem>>, %arg3: memref<1x128xf32, #tpu.memory_space<vmem>>, %arg4: memref<16x128xf32, #tpu.memory_space<vmem>>) attributes {dimension_semantics = [#tpu.dimension_semantics<parallel>], iteration_bounds = array<i64: 1>, scalar_prefetch = 0 : i64, scratch_operands = 0 : i64, tpu.core_type = #tpu.core_type<tc>, window_params = [{transform_indices = @transform_0, window_bounds = array<i64: 16, 128>}, {pipeline_mode = #tpu.pipeline_mode<synchronous>, transform_indices = @transform_1, window_bounds = array<i64: 128, 128>}, {pipeline_mode = #tpu.pipeline_mode<synchronous>, transform_indices = @transform_2, window_bounds = array<i64: 1, 128>}, {transform_indices = @transform_3, window_bounds = array<i64: 16, 128>}]} {
    %c0 = arith.constant 0 : index
    %c0_0 = arith.constant 0 : index
    %0 = vector.load %arg1[%c0, %c0_0] : memref<16x128xf32, #tpu.memory_space<vmem>>, vector<16x128xf32>
    %c0_1 = arith.constant 0 : index
    %c0_2 = arith.constant 0 : index
    %1 = vector.load %arg2[%c0_1, %c0_2] : memref<128x128xf32, #tpu.memory_space<vmem>>, vector<128x128xf32>
    %cst = arith.constant dense<0.000000e+00> : vector<16x128xf32>
    %2 = tpu.matmul %0, %1, %cst {dimension_numbers = #tpu.dot_dimension_numbers<[1], [0], [0], [1], [0, 0, 1, 1], [], []>} : vector<16x128xf32>, vector<128x128xf32>, vector<16x128xf32> -> vector<16x128xf32>
    %c0_3 = arith.constant 0 : index
    %c0_4 = arith.constant 0 : index
    %3 = vector.load %arg3[%c0_3, %c0_4] : memref<1x128xf32, #tpu.memory_space<vmem>>, vector<1x128xf32>
    %4 = vector.broadcast %3 : vector<1x128xf32> to vector<16x128xf32>
    %5 = arith.subf %2, %4 : vector<16x128xf32>
    %c0_5 = arith.constant 0 : index
    %c0_6 = arith.constant 0 : index
    %6 = vector.load %arg4[%c0_5, %c0_6] : memref<16x128xf32, #tpu.memory_space<vmem>>, vector<16x128xf32>
    tpu.vector_store %arg4[%c0_5, %c0_6], %5 {strides = array<i32>} : memref<16x128xf32, #tpu.memory_space<vmem>>, vector<16x128xf32>,
    return
  }
  func.func @transform_0(%arg0: i32) -> (i32, i32) {
    %c0_i32 = arith.constant 0 : i32
    %c0_i32_0 = arith.constant 0 : i32
    return %arg0, %c0_i32 : i32, i32
  }
  func.func @transform_1(%arg0: i32) -> (i32, i32) {
    %c0_i32 = arith.constant 0 : i32
    %c0_i32_0 = arith.constant 0 : i32
    %c0_i32_1 = arith.constant 0 : i32
    return %c0_i32, %c0_i32_0 : i32, i32
  }
  func.func @transform_2(%arg0: i32) -> (i32, i32) {
    %c0_i32 = arith.constant 0 : i32
    %c0_i32_0 = arith.constant 0 : i32
    %c0_i32_1 = arith.constant 0 : i32
    return %c0_i32, %c0_i32_0 : i32, i32
  }
  func.func @transform_3(%arg0: i32) -> (i32, i32) {
    %c0_i32 = arith.constant 0 : i32
    %c0_i32_0 = arith.constant 0 : i32
    return %arg0, %c0_i32 : i32, i32
  }
}

</mosaic_0001>

<bundles_post_ra>
// kernel: tpu_custom_call.1
= control target key start
LH: loop header
LB: loop body
LE: loop exit
PB: predicated region body
PF: predicated region fallthrough
CT: control target
= control target key end

     0   :  { %8 = vsyncpa [#allocation3], 0  ;;  %s336_s0 = inlined_call_operand.hbm [shape: f32[16,128], index: 0, kind: input, shape index: {}]   ;;  %s337_s1 = inlined_call_operand.hbm [shape: f32[128,128], index: 1, kind: input, shape index: {}]   ;;  %s338_s2 = inlined_call_operand.vmem [shape: f32[1,128], index: 2, kind: input, shape index: {}]   ;;  %s339_s3 = inlined_call_operand.hbm [shape: f32[16,128], index: 3, kind: output, shape index: {}]  }
   0x1   :  { %9 = vsyncpa [#allocation6], 0 }
   0x2   :  { %10 = vsyncpa [#allocation4], 0  ;;  %s290_s12 = smov [#allocation2]  }
   0x3   :  { %s16_s13 = sshll.u32 %s290_s12, 4  ;;  %s17_s13 = int_to_ptr.vmem [resolvable:$true] %s16_s13 }
   0x4   :  { %s232_s14 = scalar_lea.vmem %s17_s13, 256  ;;  %p237_p1 = scmp.lt.s32.totalorder %s17_s13, %s17_s13 }
   0x5   :  { %p233_p0 = scmp.ne.s32.totalorder %s17_s13, %s232_s14  ;;  %p238_p2 = scmp.lt.s32.totalorder %s232_s14, %s232_s14 }
   0x7   :  { %p239_p3 = por %p238_p2, %p237_p1 }
   0x9   :  { %p240_p4 = pnand %p239_p3, %p233_p0 }
   0xb   :  { %243 = shalt.err (!%p240_p4)
}
   0xc   :  { %s291_s15 = smov 128   ;;  %s292_s16 = smov 8  }
   0xd   :  { %22 = dma.hbm_to_vmem [thread:$0]  %s336_s0, 256, %s17_s13, [#allocation3], %s291_s15, %s291_s15, %s292_s16  }
   0xe   :  { %s293_s19 = smov [#allocation5]  }
   0xf   :  { %s28_s20 = sshll.u32 %s293_s19, 4  ;;  %s29_s20 = int_to_ptr.vmem [resolvable:$true] %s28_s20 }
  0x10   :  { %s252_s21 = scalar_lea.vmem %s29_s20, 2048  ;;  %p257_p6 = scmp.lt.s32.totalorder %s29_s20, %s29_s20 }
  0x11   :  { %p253_p5 = scmp.ne.s32.totalorder %s29_s20, %s252_s21  ;;  %p258_p7 = scmp.lt.s32.totalorder %s252_s21, %s252_s21 }
  0x13   :  { %p259_p8 = por %p258_p7, %p257_p6 }
  0x15   :  { %p260_p9 = pnand %p259_p8, %p253_p5 }
  0x17   :  { %263 = shalt.err (!%p260_p9)
}
  0x18   :  { %34 = dma.hbm_to_vmem [thread:$0]  %s337_s1, 2048, %s29_s20, [#allocation6], %s291_s15, %s291_s15, %s292_s16  }
  0x19   :  { %284 = dma.done.wait [#allocation3], 256  }
  0x1a   :  { %285 = vsyncadd [#allocation3], 4294967040 }
  0x1b   :  { %286 = dma.done.wait [#allocation6], 2048  }
  0x1c   :  { %287 = vsyncadd [#allocation6], 4294965248  ;;  %v60_v0 = vld [vmem:[#allocation5 + $0x78] sm:$0xff]  ;;  %v59_v1 = vld [vmem:[#allocation5 + $0x70] sm:$0xff]  ;;  %s294_s24 = smov [#allocation7]  }
  0x1d   :  { %184 = vmatprep.subr.mxu0 %v60_v0  ;;  %v58_v2 = vld [vmem:[#allocation5 + $0x68] sm:$0xff]  ;;  %v57_v3 = vld [vmem:[#allocation5 + $0x60] sm:$0xff]  ;;  %v43_v4 = vld [vmem:[#allocation2] sm:$0xff]  ;;  %s152_s25 = sshll.u32 %s294_s24, 4  ;;  %s153_s25 = int_to_ptr.vmem [resolvable:$true] %s152_s25 }
  0x1e   :  { %185 = vmatpush3.msra.mxu0 %v60_v0  ;;  %v56_v5 = vld [vmem:[#allocation5 + $0x58] sm:$0xff]  ;;  %216 = vmatprep.mubr.f32.mxu0 %v43_v4  ;;  %v55_v6 = vld [vmem:[#allocation5 + $0x50] sm:$0xff]  ;;  %v54_v7 = vld [vmem:[#allocation5 + $0x48] sm:$0xff]  ;;  %s264_s26 = scalar_lea.vmem %s153_s25, 256  ;;  %p269_p11 = scmp.lt.s32.totalorder %s153_s25, %s153_s25 }
  0x1f   :  { %186 = vmatprep.subr.mxu0 %v59_v1  ;;  %v53_v8 = vld [vmem:[#allocation5 + $0x40] sm:$0xff]  ;;  %v52_v9 = vld [vmem:[#allocation5 + $0x38] sm:$0xff]  ;;  %v51_v10 = vld [vmem:[#allocation5 + $0x30] sm:$0xff]  ;;  %p265_p10 = scmp.ne.s32.totalorder %s153_s25, %s264_s26  ;;  %p270_p12 = scmp.lt.s32.totalorder %s264_s26, %s264_s26 }
  0x20   :  { %187 = vmatpush3.msra.mxu0 %v59_v1  ;;  %v50_v11 = vld [vmem:[#allocation5 + $0x28] sm:$0xff]  ;;  %v49_v12 = vld [vmem:[#allocation5 + $0x20] sm:$0xff]  ;;  %v48_v13 = vld [vmem:[#allocation5 + $0x18] sm:$0xff] }
  0x21   :  { %188 = vmatprep.subr.mxu0 %v58_v2  ;;  %v47_v14 = vld [vmem:[#allocation5 + $0x10] sm:$0xff]  ;;  %v46_v15 = vld [vmem:[#allocation5 + $0x8] sm:$0xff]  ;;  %v45_v16 = vld [vmem:[#allocation5] sm:$0xff]  ;;  %p271_p13 = por %p270_p12, %p269_p11 }
  0x22   :  { %189 = vmatpush3.msra.mxu0 %v58_v2  ;;  %v44_v17 = vld [vmem:[#allocation2 + $0x8] sm:$0xff]  ;;  %v165_v18 = vld [vmem:[%s338_s2] ss:$0 sm:$0xff] }
  0x23   :  { %190 = vmatprep.subr.mxu0 %v57_v3  ;;  %p272_p0 = pnand %p271_p13, %p265_p10 }
  0x24   :  { %191 = vmatpush3.msra.mxu0 %v57_v3 }
  0x25   :  { %192 = vmatprep.subr.mxu0 %v56_v5 }
  0x26   :  { %193 = vmatpush3.msra.mxu0 %v56_v5 }
  0x27   :  { %194 = vmatprep.subr.mxu0 %v55_v6 }
  0x28   :  { %195 = vmatpush3.msra.mxu0 %v55_v6 }
  0x29   :  { %196 = vmatprep.subr.mxu0 %v54_v7 }
  0x2a   :  { %197 = vmatpush3.msra.mxu0 %v54_v7 }
  0x2b   :  { %198 = vmatprep.subr.mxu0 %v53_v8 }
  0x2c   :  { %199 = vmatpush3.msra.mxu0 %v53_v8 }
  0x2d   :  { %200 = vmatprep.subr.mxu0 %v52_v9 }
  0x2e   :  { %201 = vmatpush3.msra.mxu0 %v52_v9 }
  0x2f   :  { %202 = vmatprep.subr.mxu0 %v51_v10 }
  0x30   :  { %203 = vmatpush3.msra.mxu0 %v51_v10 }
  0x31   :  { %204 = vmatprep.subr.mxu0 %v50_v11 }
  0x32   :  { %205 = vmatpush3.msra.mxu0 %v50_v11 }
  0x33   :  { %206 = vmatprep.subr.mxu0 %v49_v12 }
  0x34   :  { %207 = vmatpush3.msra.mxu0 %v49_v12 }
  0x35   :  { %208 = vmatprep.subr.mxu0 %v48_v13 }
  0x36   :  { %209 = vmatpush3.msra.mxu0 %v48_v13 }
  0x37   :  { %210 = vmatprep.subr.mxu0 %v47_v14 }
  0x38   :  { %211 = vmatpush3.msra.mxu0 %v47_v14 }
  0x39   :  { %212 = vmatprep.subr.mxu0 %v46_v15 }
  0x3a   :  { %213 = vmatpush3.msra.mxu0 %v46_v15 }
  0x3b   :  { %214 = vmatprep.subr.mxu0 %v45_v16 }
  0x3c   :  { %215 = vmatpush3.msra.mxu0 %v45_v16 }
  0x3d   :  { %217 = vmatmul.mubr.f32.vlgmr.msra.gmra.mxu0 %v44_v17 }
  0xfd   :  { %v218_v19 = vpop.f32.mrf.mxu0 }
  0xfe   :  { %v144_v20 = vsub.f32 %v218_v19, %v165_v18 }
  0xff   :  { %v127_v21 = vpop.f32.mrf.mxu0 }
 0x100   :  { %146 = vst [vmem:[#allocation7 + $0x8] sm:$0xff] %v144_v20  ;;  %v143_v22 = vsub.f32 %v127_v21, %v165_v18 }
 0x102   :  { %145 = vst [vmem:[#allocation7] sm:$0xff] %v143_v22 }
 0x103   :  { %275 = shalt.err (!%p272_p0)
}
 0x104   :  { %158 = dma.vmem_to_hbm [thread:$0]  %s153_s25, 256, %s339_s3, [#allocation4], %s291_s15, %s291_s15, %s292_s16  }
 0x105   :  { %288 = dma.done.wait [#allocation4], 256  }
 0x106   :  { %289 = vsyncadd [#allocation4], 4294967040 }
 0x107   :  { %162 = vsyncpa [#allocation3], 1 }
 0x108   :  { %163 = vsyncpa [#allocation6], 1 }
 0x109   :  { %164 = vsyncpa [#allocation4], 1 }

// kernel: tpu_custom_call.1
= control target key start
LH: loop header
LB: loop body
LE: loop exit
PB: predicated region body
PF: predicated region fallthrough
CT: control target
= control target key end

     0   :  { %8 = vsyncpa [#allocation3], 0  ;;  %s336_s0 = inlined_call_operand.hbm [shape: f32[16,128], index: 0, kind: input, shape index: {}]   ;;  %s337_s1 = inlined_call_operand.hbm [shape: f32[128,128], index: 1, kind: input, shape index: {}]   ;;  %s338_s2 = inlined_call_operand.vmem [shape: f32[1,128], index: 2, kind: input, shape index: {}]   ;;  %s339_s3 = inlined_call_operand.hbm [shape: f32[16,128], index: 3, kind: output, shape index: {}]  }
   0x1   :  { %9 = vsyncpa [#allocation6], 0 }
   0x2   :  { %10 = vsyncpa [#allocation4], 0  ;;  %s290_s12 = smov [#allocation2]  }
   0x3   :  { %s16_s13 = sshll.u32 %s290_s12, 4  ;;  %s17_s13 = int_to_ptr.vmem [resolvable:$true] %s16_s13 }
   0x4   :  { %s232_s14 = scalar_lea.vmem %s17_s13, 256  ;;  %p237_p1 = scmp.lt.s32.totalorder %s17_s13, %s17_s13 }
   0x5   :  { %p233_p0 = scmp.ne.s32.totalorder %s17_s13, %s232_s14  ;;  %p238_p2 = scmp.lt.s32.totalorder %s232_s14, %s232_s14 }
   0x7   :  { %p239_p3 = por %p238_p2, %p237_p1 }
   0x9   :  { %p240_p4 = pnand %p239_p3, %p233_p0 }
   0xb   :  { %243 = shalt.err (!%p240_p4)
}
   0xc   :  { %s291_s15 = smov 128   ;;  %s292_s16 = smov 8  }
   0xd   :  { %22 = dma.hbm_to_vmem [thread:$0]  %s336_s0, 256, %s17_s13, [#allocation3], %s291_s15, %s291_s15, %s292_s16  }
   0xe   :  { %s293_s19 = smov [#allocation5]  }
   0xf   :  { %s28_s20 = sshll.u32 %s293_s19, 4  ;;  %s29_s20 = int_to_ptr.vmem [resolvable:$true] %s28_s20 }
  0x10   :  { %s252_s21 = scalar_lea.vmem %s29_s20, 2048  ;;  %p257_p6 = scmp.lt.s32.totalorder %s29_s20, %s29_s20 }
  0x11   :  { %p253_p5 = scmp.ne.s32.totalorder %s29_s20, %s252_s21  ;;  %p258_p7 = scmp.lt.s32.totalorder %s252_s21, %s252_s21 }
  0x13   :  { %p259_p8 = por %p258_p7, %p257_p6 }
  0x15   :  { %p260_p9 = pnand %p259_p8, %p253_p5 }
  0x17   :  { %263 = shalt.err (!%p260_p9)
}
  0x18   :  { %34 = dma.hbm_to_vmem [thread:$0]  %s337_s1, 2048, %s29_s20, [#allocation6], %s291_s15, %s291_s15, %s292_s16  }
  0x19   :  { %284 = dma.done.wait [#allocation3], 256  }
  0x1a   :  { %285 = vsyncadd [#allocation3], 4294967040 }
  0x1b   :  { %286 = dma.done.wait [#allocation6], 2048  }
  0x1c   :  { %287 = vsyncadd [#allocation6], 4294965248  ;;  %v60_v0 = vld [vmem:[#allocation5 + $0x78] sm:$0xff]  ;;  %v59_v1 = vld [vmem:[#allocation5 + $0x70] sm:$0xff]  ;;  %s294_s24 = smov [#allocation7]  }
  0x1d   :  { %184 = vmatprep.subr.mxu0 %v60_v0  ;;  %v58_v2 = vld [vmem:[#allocation5 + $0x68] sm:$0xff]  ;;  %v57_v3 = vld [vmem:[#allocation5 + $0x60] sm:$0xff]  ;;  %v43_v4 = vld [vmem:[#allocation2] sm:$0xff]  ;;  %s152_s25 = sshll.u32 %s294_s24, 4  ;;  %s153_s25 = int_to_ptr.vmem [resolvable:$true] %s152_s25 }
  0x1e   :  { %185 = vmatpush3.msra.mxu0 %v60_v0  ;;  %v56_v5 = vld [vmem:[#allocation5 + $0x58] sm:$0xff]  ;;  %216 = vmatprep.mubr.f32.mxu0 %v43_v4  ;;  %v55_v6 = vld [vmem:[#allocation5 + $0x50] sm:$0xff]  ;;  %v54_v7 = vld [vmem:[#allocation5 + $0x48] sm:$0xff]  ;;  %s264_s26 = scalar_lea.vmem %s153_s25, 256  ;;  %p269_p11 = scmp.lt.s32.totalorder %s153_s25, %s153_s25 }
  0x1f   :  { %186 = vmatprep.subr.mxu0 %v59_v1  ;;  %v53_v8 = vld [vmem:[#allocation5 + $0x40] sm:$0xff]  ;;  %v52_v9 = vld [vmem:[#allocation5 + $0x38] sm:$0xff]  ;;  %v51_v10 = vld [vmem:[#allocation5 + $0x30] sm:$0xff]  ;;  %p265_p10 = scmp.ne.s32.totalorder %s153_s25, %s264_s26  ;;  %p270_p12 = scmp.lt.s32.totalorder %s264_s26, %s264_s26 }
  0x20   :  { %187 = vmatpush3.msra.mxu0 %v59_v1  ;;  %v50_v11 = vld [vmem:[#allocation5 + $0x28] sm:$0xff]  ;;  %v49_v12 = vld [vmem:[#allocation5 + $0x20] sm:$0xff]  ;;  %v48_v13 = vld [vmem:[#allocation5 + $0x18] sm:$0xff] }
  0x21   :  { %188 = vmatprep.subr.mxu0 %v58_v2  ;;  %v47_v14 = vld [vmem:[#allocation5 + $0x10] sm:$0xff]  ;;  %v46_v15 = vld [vmem:[#allocation5 + $0x8] sm:$0xff]  ;;  %v45_v16 = vld [vmem:[#allocation5] sm:$0xff]  ;;  %p271_p13 = por %p270_p12, %p269_p11 }
  0x22   :  { %189 = vmatpush3.msra.mxu0 %v58_v2  ;;  %v44_v17 = vld [vmem:[#allocation2 + $0x8] sm:$0xff]  ;;  %v165_v18 = vld [vmem:[%s338_s2] ss:$0 sm:$0xff] }
  0x23   :  { %190 = vmatprep.subr.mxu0 %v57_v3  ;;  %p272_p0 = pnand %p271_p13, %p265_p10 }
  0x24   :  { %191 = vmatpush3.msra.mxu0 %v57_v3 }
  0x25   :  { %192 = vmatprep.subr.mxu0 %v56_v5 }
  0x26   :  { %193 = vmatpush3.msra.mxu0 %v56_v5 }
  0x27   :  { %194 = vmatprep.subr.mxu0 %v55_v6 }
  0x28   :  { %195 = vmatpush3.msra.mxu0 %v55_v6 }
  0x29   :  { %196 = vmatprep.subr.mxu0 %v54_v7 }
  0x2a   :  { %197 = vmatpush3.msra.mxu0 %v54_v7 }
  0x2b   :  { %198 = vmatprep.subr.mxu0 %v53_v8 }
  0x2c   :  { %199 = vmatpush3.msra.mxu0 %v53_v8 }
  0x2d   :  { %200 = vmatprep.subr.mxu0 %v52_v9 }
  0x2e   :  { %201 = vmatpush3.msra.mxu0 %v52_v9 }
  0x2f   :  { %202 = vmatprep.subr.mxu0 %v51_v10 }
  0x30   :  { %203 = vmatpush3.msra.mxu0 %v51_v10 }
  0x31   :  { %204 = vmatprep.subr.mxu0 %v50_v11 }
  0x32   :  { %205 = vmatpush3.msra.mxu0 %v50_v11 }
  0x33   :  { %206 = vmatprep.subr.mxu0 %v49_v12 }
  0x34   :  { %207 = vmatpush3.msra.mxu0 %v49_v12 }
  0x35   :  { %208 = vmatprep.subr.mxu0 %v48_v13 }
  0x36   :  { %209 = vmatpush3.msra.mxu0 %v48_v13 }
  0x37   :  { %210 = vmatprep.subr.mxu0 %v47_v14 }
  0x38   :  { %211 = vmatpush3.msra.mxu0 %v47_v14 }
  0x39   :  { %212 = vmatprep.subr.mxu0 %v46_v15 }
  0x3a   :  { %213 = vmatpush3.msra.mxu0 %v46_v15 }
  0x3b   :  { %214 = vmatprep.subr.mxu0 %v45_v16 }
  0x3c   :  { %215 = vmatpush3.msra.mxu0 %v45_v16 }
  0x3d   :  { %217 = vmatmul.mubr.f32.vlgmr.msra.gmra.mxu0 %v44_v17 }
  0xfd   :  { %v218_v19 = vpop.f32.mrf.mxu0 }
  0xfe   :  { %v144_v20 = vsub.f32 %v218_v19, %v165_v18 }
  0xff   :  { %v127_v21 = vpop.f32.mrf.mxu0 }
 0x100   :  { %146 = vst [vmem:[#allocation7 + $0x8] sm:$0xff] %v144_v20  ;;  %v143_v22 = vsub.f32 %v127_v21, %v165_v18 }
 0x102   :  { %145 = vst [vmem:[#allocation7] sm:$0xff] %v143_v22 }
 0x103   :  { %275 = shalt.err (!%p272_p0)
}
 0x104   :  { %158 = dma.vmem_to_hbm [thread:$0]  %s153_s25, 256, %s339_s3, [#allocation4], %s291_s15, %s291_s15, %s292_s16  }
 0x105   :  { %288 = dma.done.wait [#allocation4], 256  }
 0x106   :  { %289 = vsyncadd [#allocation4], 4294967040 }
 0x107   :  { %162 = vsyncpa [#allocation3], 1 }
 0x108   :  { %163 = vsyncpa [#allocation6], 1 }
 0x109   :  { %164 = vsyncpa [#allocation4], 1 }

</bundles_post_ra>
